<compile_context>
chip_gen: v6e
topology: v6e:2x2x1
jax: 0.10.0
libtpu: 0.0.40
codegen_flags: <defaults>
</compile_context>

<pallas_src>
import functools

import jax
import jax.numpy as jnp
from jax.experimental import pallas as pl
from jax.experimental.pallas import tpu as pltpu


# ------------------------------ Pallas kernel -------------------------------
def _upsample_kernel(x_ref, w_ref, o_ref, lhs_ref, *, h, wc, kpad):
    """Fused conv3x3(pad=1) + bias + swish for one batch element.

    x_ref:   (1, H, W*C)      f32  channel-minor input rows
    w_ref:   (Kpad, W*Cout)   bf16 fused weights (3 row taps | bias row | 0-pad)
    o_ref:   (1, H, W*Cout)   f32  lane-dense pre-pixel-shuffle output
    lhs_ref: (H, Kpad)        f32  staged matmul LHS
    """
    x = x_ref[0]                                            # (H, W*C)

    # Stage the fused LHS: [x(r-1) | x(r) | x(r+1) | 1 | 0...].  Each region is
    # written exactly once (no full memset; only the two height-padding
    # boundary rows and the tail block get explicit zeros).
    lhs_ref[:, wc:2 * wc] = x                               # centre tap (kh=1)
    lhs_ref[0:1, 0:wc] = jnp.zeros((1, wc), jnp.float32)    # top zero pad
    lhs_ref[1:h, 0:wc] = x[0:h - 1, :]                      # row above (kh=0)
    lhs_ref[0:h - 1, 2 * wc:3 * wc] = x[1:h, :]             # row below (kh=2)
    lhs_ref[h - 1:h, 2 * wc:3 * wc] = jnp.zeros((1, wc), jnp.float32)
    lane = jax.lax.broadcasted_iota(jnp.int32, (h, kpad - 3 * wc), 1)
    lhs_ref[:, 3 * wc:] = jnp.where(lane == 0, 1.0, 0.0).astype(jnp.float32)

    # One bf16 MXU matmul with f32 accumulation; the bias rides on the ones
    # column (weight row 3*wc), so there is no separate bias add.
    z = jnp.dot(lhs_ref[...].astype(jnp.bfloat16), w_ref[...],
                preferred_element_type=jnp.float32)

    # Swish: z * sigmoid(z); tanh form keeps the transcendental on the EUP.
    o_ref[0] = z * (0.5 * jnp.tanh(0.5 * z) + 0.5)


# --------------------- one-time weight pre-packing --------------------------
def pack_upsample_params(conv_w, conv_b, width):
    """Pack (Cout, Cin, 3, 3) conv weights + bias into ONE (Kpad, W*Cout) bf16
    matmul operand.  Runs once at parameter-initialization time.

      row[kh*W*Cin + wi*Cin + ci] = conv_w[co, ci, kh, wi - wo + 1]   (0 if OOR)
      row[3*W*Cin]                = bias tiled over wo
      remaining rows              = 0  (K padding up to a 128 multiple)

    Out-of-range width taps are simply absent, which is exactly Conv2d's zero
    padding along W, so the kernel only has to zero-pad along H.
    Assumes stride=1, padding=1, 3x3 kernel, channel-minor lane layout.
    """
    co_n, ci_n, kh_n, kw_n = conv_w.shape
    wc = width * ci_n
    kpad = ((kh_n * wc + 1 + 127) // 128) * 128

    wi = jnp.arange(width)[:, None]                     # (W, 1) input col
    wo = jnp.arange(width)[None, :]                     # (1, W) output col
    kw = wi - wo + 1                                    # (W, W)
    valid = (kw >= 0) & (kw < kw_n)
    g = jnp.transpose(conv_w, (2, 3, 1, 0))             # (KH, KW, Cin, Cout)
    sel = g[:, jnp.clip(kw, 0, kw_n - 1)]               # (KH, W, W, Cin, Cout)
    sel = jnp.where(valid[None, :, :, None, None], sel, 0.0)
    band = jnp.transpose(sel, (0, 1, 3, 2, 4)).reshape(kh_n * wc, width * co_n)

    w_fused = jnp.zeros((kpad, width * co_n), jnp.float32)
    w_fused = w_fused.at[:kh_n * wc].set(band)
    w_fused = w_fused.at[kh_n * wc].set(jnp.tile(conv_b, width))   # bias row
    return w_fused.astype(jnp.bfloat16)


# --------------------------------- wrapper ----------------------------------
@jax.jit
def upsample_block_forward(x_nchw, w_fused):
    """x_nchw: (N, C, H, W) f32, w_fused: (Kpad, W*Cout) bf16 -> (N, C, 2H, 2W)."""
    n, c, h, w = x_nchw.shape
    kpad, wcout = w_fused.shape
    cout = wcout // w
    r = 2
    wc = w * c

    # NCHW -> (N, H, W*C): one XLA transpose so the conv contraction sees a
    # channel-minor, lane-dense K axis.
    x_lanes = jnp.transpose(x_nchw, (0, 2, 3, 1)).reshape(n, h, wc)
    x_lanes = x_lanes.astype(jnp.float32)

    kernel = functools.partial(_upsample_kernel, h=h, wc=wc, kpad=kpad)
    out2 = pl.pallas_call(
        kernel,
        out_shape=jax.ShapeDtypeStruct((n, h, wcout), jnp.float32),
        grid=(n,),
        in_specs=[
            pl.BlockSpec((1, h, wc), lambda i: (i, 0, 0)),
            pl.BlockSpec((kpad, wcout), lambda i: (0, 0)),   # weight stays resident
        ],
        out_specs=pl.BlockSpec((1, h, wcout), lambda i: (i, 0, 0)),
        scratch_shapes=[pltpu.VMEM((h, kpad), jnp.float32)],
        compiler_params=pltpu.CompilerParams(
            dimension_semantics=("parallel",)),
    )(x_lanes, w_fused)

    # PixelShuffle(2) + back to NCHW: pure layout plumbing on the lane-dense slab.
    # out2[n, h, w*Cout + c*4 + i*2 + j] -> y[n, c, 2h+i, 2w+j]
    y = out2.reshape(n, h, w, cout // (r * r), r, r).transpose(0, 3, 1, 4, 2, 5)
    return y.reshape(n, cout // (r * r), h * r, w * r)


# ---------------------------- pure-JAX reference ----------------------------
def upsample_block_reference(x_nchw, params):
    y = jax.lax.conv_general_dilated(
        x_nchw, params["conv_w"], window_strides=(1, 1), padding="SAME",
        dimension_numbers=("NCHW", "OIHW", "NCHW"))
    y = y + params["conv_b"][None, :, None, None]
    n, c4, h, w = y.shape
    r = 2
    c = c4 // (r * r)
    y = y.reshape(n, c, r, r, h, w).transpose(0, 1, 4, 2, 5, 3)
    y = y.reshape(n, c, h * r, w * r)
    return y * jax.nn.sigmoid(y)


if __name__ == "__main__":
    num_filters = 4
    N, C, H, W = 2, num_filters, 16, 16
    key = jax.random.PRNGKey(0)
    k_w, k_b, k_x = jax.random.split(key, 3)
    params = {
        "conv_w": 0.1 * jax.random.normal(k_w, (4 * C, C, 3, 3), jnp.float32),
        "conv_b": 0.1 * jax.random.normal(k_b, (4 * C,), jnp.float32),
    }
    x = jax.random.normal(k_x, (N, C, H, W), jnp.float32)

    # Weight preprocessing runs ONCE per model (hoisted out of the forward).
    w_fused = pack_upsample_params(params["conv_w"], params["conv_b"], W)

    out = jax.block_until_ready(upsample_block_forward(x, w_fused))
    ref = jax.block_until_ready(upsample_block_reference(x, params))

    assert out.shape == (N, C, 2 * H, 2 * W), out.shape
    max_err = float(jnp.max(jnp.abs(out - ref)))
    # bf16 MXU operands with f32 accumulation: tolerance sized for bf16 precision.
    assert jnp.allclose(out, ref, atol=5e-2, rtol=5e-2), max_err
    print("KERNEL_OK")
</pallas_src>

<mosaic_0001>
module attributes {stable_mosaic.version = 11 : i64} {
  func.func @_upsample_kernel(%arg0: i32, %arg1: memref<1x16x64xf32, #tpu.memory_space<vmem>>, %arg2: memref<256x256xbf16, #tpu.memory_space<vmem>>, %arg3: memref<1x16x256xf32, #tpu.memory_space<vmem>>, %arg4: memref<16x256xf32, #tpu.memory_space<vmem>>) attributes {dimension_semantics = [#tpu.dimension_semantics<parallel>], iteration_bounds = array<i64: 2>, scalar_prefetch = 0 : i64, scratch_operands = 1 : i64, tpu.core_type = #tpu.core_type<tc>, window_params = [{transform_indices = @transform_0, window_bounds = array<i64: 1, 16, 64>}, {pipeline_mode = #tpu.pipeline_mode<synchronous>, transform_indices = @transform_1, window_bounds = array<i64: 256, 256>}, {transform_indices = @transform_2, window_bounds = array<i64: 1, 16, 256>}]} {
    %c0 = arith.constant 0 : index
    %c0_0 = arith.constant 0 : index
    %c0_1 = arith.constant 0 : index
    %0 = vector.load %arg1[%c0, %c0_0, %c0_1] : memref<1x16x64xf32, #tpu.memory_space<vmem>>, vector<1x16x64xf32>
    %1 = vector.shape_cast %0 : vector<1x16x64xf32> to vector<16x64xf32>
    %c0_2 = arith.constant 0 : index
    %c64 = arith.constant 64 : index
    %2 = vector.load %arg4[%c0_2, %c64] : memref<16x256xf32, #tpu.memory_space<vmem>>, vector<16x64xf32>
    tpu.vector_store %arg4[%c0_2, %c64], %1 {strides = array<i32>} : memref<16x256xf32, #tpu.memory_space<vmem>>, vector<16x64xf32>,
    %cst = arith.constant 0.000000e+00 : f32
    %3 = vector.broadcast %cst : f32 to vector<1x64xf32>
    %c0_3 = arith.constant 0 : index
    %c0_4 = arith.constant 0 : index
    %4 = vector.load %arg4[%c0_3, %c0_4] : memref<16x256xf32, #tpu.memory_space<vmem>>, vector<1x64xf32>
    tpu.vector_store %arg4[%c0_3, %c0_4], %3 {strides = array<i32>} : memref<16x256xf32, #tpu.memory_space<vmem>>, vector<1x64xf32>,
    %5 = vector.extract_strided_slice %1 {offsets = [0, 0], sizes = [15, 64], strides = [1, 1]} : vector<16x64xf32> to vector<15x64xf32>
    %c1 = arith.constant 1 : index
    %c0_5 = arith.constant 0 : index
    %6 = vector.load %arg4[%c1, %c0_5] : memref<16x256xf32, #tpu.memory_space<vmem>>, vector<15x64xf32>
    tpu.vector_store %arg4[%c1, %c0_5], %5 {strides = array<i32>} : memref<16x256xf32, #tpu.memory_space<vmem>>, vector<15x64xf32>,
    %7 = vector.extract_strided_slice %1 {offsets = [1, 0], sizes = [15, 64], strides = [1, 1]} : vector<16x64xf32> to vector<15x64xf32>
    %c0_6 = arith.constant 0 : index
    %c128 = arith.constant 128 : index
    %8 = vector.load %arg4[%c0_6, %c128] : memref<16x256xf32, #tpu.memory_space<vmem>>, vector<15x64xf32>
    tpu.vector_store %arg4[%c0_6, %c128], %7 {strides = array<i32>} : memref<16x256xf32, #tpu.memory_space<vmem>>, vector<15x64xf32>,
    %cst_7 = arith.constant 0.000000e+00 : f32
    %9 = vector.broadcast %cst_7 : f32 to vector<1x64xf32>
    %c15 = arith.constant 15 : index
    %c128_8 = arith.constant 128 : index
    %10 = vector.load %arg4[%c15, %c128_8] : memref<16x256xf32, #tpu.memory_space<vmem>>, vector<1x64xf32>
    tpu.vector_store %arg4[%c15, %c128_8], %9 {strides = array<i32>} : memref<16x256xf32, #tpu.memory_space<vmem>>, vector<1x64xf32>,
    %11 = tpu.iota {dimensions = array<i32: 1>} : vector<16x64xi32>
    %c0_i32 = arith.constant 0 : i32
    %12 = vector.broadcast %c0_i32 : i32 to vector<16x64xi32>
    %13 = arith.cmpi eq, %11, %12 : vector<16x64xi32>
    %cst_9 = arith.constant 1.000000e+00 : f32
    %cst_10 = arith.constant 0.000000e+00 : f32
    %14 = vector.broadcast %cst_9 : f32 to vector<16x64xf32>
    %15 = vector.broadcast %cst_10 : f32 to vector<16x64xf32>
    %16 = arith.select %13, %14, %15 : vector<16x64xi1>, vector<16x64xf32>
    %c0_11 = arith.constant 0 : index
    %c192 = arith.constant 192 : index
    %17 = vector.load %arg4[%c0_11, %c192] : memref<16x256xf32, #tpu.memory_space<vmem>>, vector<16x64xf32>
    tpu.vector_store %arg4[%c0_11, %c192], %16 {strides = array<i32>} : memref<16x256xf32, #tpu.memory_space<vmem>>, vector<16x64xf32>,
    %c0_12 = arith.constant 0 : index
    %c0_13 = arith.constant 0 : index
    %18 = vector.load %arg4[%c0_12, %c0_13] : memref<16x256xf32, #tpu.memory_space<vmem>>, vector<16x256xf32>
    %19 = arith.truncf %18 : vector<16x256xf32> to vector<16x256xbf16>
    %c0_14 = arith.constant 0 : index
    %c0_15 = arith.constant 0 : index
    %20 = vector.load %arg2[%c0_14, %c0_15] : memref<256x256xbf16, #tpu.memory_space<vmem>>, vector<256x256xbf16>
    %cst_16 = arith.constant dense<0.000000e+00> : vector<16x256xf32>
    %21 = tpu.matmul %19, %20, %cst_16 {dimension_numbers = #tpu.dot_dimension_numbers<[1], [0], [0], [1], [0, 0, 1, 1], [], []>} : vector<16x256xbf16>, vector<256x256xbf16>, vector<16x256xf32> -> vector<16x256xf32>
    %cst_17 = arith.constant 5.000000e-01 : f32
    %22 = vector.broadcast %cst_17 : f32 to vector<16x256xf32>
    %23 = arith.mulf %22, %21 : vector<16x256xf32>
    %24 = math.tanh %23 : vector<16x256xf32>
    %cst_18 = arith.constant 5.000000e-01 : f32
    %25 = vector.broadcast %cst_18 : f32 to vector<16x256xf32>
    %26 = arith.mulf %25, %24 : vector<16x256xf32>
    %cst_19 = arith.constant 5.000000e-01 : f32
    %27 = vector.broadcast %cst_19 : f32 to vector<16x256xf32>
    %28 = arith.addf %26, %27 : vector<16x256xf32>
    %29 = arith.mulf %21, %28 : vector<16x256xf32>
    %c0_20 = arith.constant 0 : index
    %c0_21 = arith.constant 0 : index
    %c0_22 = arith.constant 0 : index
    %30 = vector.load %arg3[%c0_20, %c0_21, %c0_22] : memref<1x16x256xf32, #tpu.memory_space<vmem>>, vector<1x16x256xf32>
    %31 = vector.shape_cast %30 : vector<1x16x256xf32> to vector<16x256xf32>
    %32 = vector.shape_cast %29 : vector<16x256xf32> to vector<1x16x256xf32>
    tpu.vector_store %arg3[%c0_20, %c0_21, %c0_22], %32 {strides = array<i32>} : memref<1x16x256xf32, #tpu.memory_space<vmem>>, vector<1x16x256xf32>,
    return
  }
  func.func @transform_0(%arg0: i32) -> (i32, i32, i32) {
    %c0_i32 = arith.constant 0 : i32
    %c0_i32_0 = arith.constant 0 : i32
    %c0_i32_1 = arith.constant 0 : i32
    return %arg0, %c0_i32, %c0_i32_0 : i32, i32, i32
  }
  func.func @transform_1(%arg0: i32) -> (i32, i32) {
    %c0_i32 = arith.constant 0 : i32
    %c0_i32_0 = arith.constant 0 : i32
    %c0_i32_1 = arith.constant 0 : i32
    return %c0_i32, %c0_i32_0 : i32, i32
  }
  func.func @transform_2(%arg0: i32) -> (i32, i32, i32) {
    %c0_i32 = arith.constant 0 : i32
    %c0_i32_0 = arith.constant 0 : i32
    %c0_i32_1 = arith.constant 0 : i32
    return %arg0, %c0_i32, %c0_i32_0 : i32, i32, i32
  }
}

</mosaic_0001>

<bundles_post_ra>
// kernel: upsample_block_forward.1
= control target key start
LH: loop header
LB: loop body
LE: loop exit
PB: predicated region body
PF: predicated region fallthrough
CT: control target
= control target key end

     0   :  { %s643_s9 = smov 0   ;;  %s785_s0 = inlined_call_operand.vmem [shape: f32[2,16,64], index: 0, kind: input, shape index: {}]   ;;  %s786_s1 = inlined_call_operand.vmem [shape: bf16[256,256], index: 1, kind: input, shape index: {}]   ;;  %s787_s2 = inlined_call_operand.vmem [shape: f32[2,16,256], index: 2, kind: output, shape index: {}]  }
   0x1 LB: > { %s509_s10 = sadd.s32 4294967295, %s624_s9   ;;  %p513_p0 = scmp.ge.s32.totalorder %s624_s9, 1  ;;  %s624_s9 = sphi %s643_s9, %s12_s9  }
   0x2   : > { %p112_p1 = scmp.lt.s32.totalorder %s624_s9, 3 }
   0x4   : > { %p113_p2 = pnand %p513_p0, %p112_p1 }
   0x5   : > { %p134_p3 = scmp.lt.s32.totalorder (!%p113_p2), %s509_s10, 1  ;;  %s627_s25 = smov (!%p113_p2), 64  }
   0x6   : > { %116 = sbr.rel (%p113_p2) target bundleno = 368 (0x170), region = 28 }
   0xb   : > { %vm157_vm0 = vcmask 516096   ;;  %v179_v0 = vlaneseq  ;;  %v626_v1 = vmov 0.0   ;;  %v564_v2 = vld [vmem:[%s786_s1 + $0x74] ss:$8 sps:$4 sm:$0xff]   ;;  %v566_v3 = vld [vmem:[%s786_s1 + $0x70] ss:$8 sps:$4 sm:$0xff]  }
   0xc   : > { %178 = vst.msk [vmem:[#allocation2 + $0x1f] sm:$0x1] %vm157_vm0, %v626_v1  ;;  %s789_s10 = smov (!%p134_p3, %s509_s10), 1  ;;  %v567_v5 = vld [vmem:[%s786_s1 + $0x64] ss:$8 sps:$4 sm:$0xff]   ;;  %387 = vmatprep.subr.bf16.mxu0 %v564_v2  ;;  %vm176_vm2 = vcmask 522240  }
   0xd   : > { %v180_v4 = vand.u32 127, %v179_v0  ;;  %s552_s17 = sshll.u32 %s789_s10, 4  ;;  %388 = vmatpush1.bf16.msra.mxu0 %v566_v3  ;;  %v569_v6 = vld [vmem:[%s786_s1 + $0x60] ss:$8 sps:$4 sm:$0xff]   ;;  %v570_v8 = vld [vmem:[%s786_s1 + $0x54] ss:$8 sps:$4 sm:$0xff]  }
   0xe   : > { %s138_s22 = scalar_lea.vmem %s785_s0, %s552_s17  ;;  %389 = vmatprep.subr.bf16.mxu0 %v567_v5  ;;  %vm167_vm3 = vcmask 523264   ;;  %vm169_vm4 = vcmask 1046528   ;;  %vm159_vm5 = vcmask 1040384   ;;  %v572_v15 = vld [vmem:[%s786_s1 + $0x50] ss:$8 sps:$4 sm:$0xff]   ;;  %v215_v40 = vld [vmem:[%s786_s1 + $0xa0] sm:$0xff] }
   0xf   : > { %vm181_vm1 = vcmp.eq.s32.totalorder %v180_v4, 0  ;;  %v675_v9 = vld [vmem:[%s138_s22] sm:$0xff]  ;;  %v145_v10 = vld [vmem:[%s138_s22 + $0x8] sm:$0xff]  ;;  %v576_v20 = vld [vmem:[%s786_s1 + $0x34] ss:$8 sps:$4 sm:$0xff]   ;;  %vm154_vm6 = vcmask 1048064  }
  0x10   : > { %v182_v7 = vsel %vm181_vm1, 1.0, %v626_v1  ;;  %148 = vrot.lane.b32.xlu0 %v675_v9, %s627_s25  ;;  %v160_v11 = vrot.slane %v675_v9, 7  ;;  %v170_v12 = vrot.slane %v675_v9, 1  ;;  %v161_v13 = vrot.slane %v145_v10, 7  ;;  %v573_v16 = vld [vmem:[%s786_s1 + $0x44] ss:$8 sps:$4 sm:$0xff]  }
  0x11   : > { %184 = vrot.lane.b32.xlu1 %v182_v7, %s627_s25  ;;  %v171_v14 = vrot.slane %v145_v10, 1  ;;  %390 = vmatpush1.bf16.msra.mxu0 %v569_v6  ;;  %v575_v19 = vld [vmem:[%s786_s1 + $0x40] ss:$8 sps:$4 sm:$0xff]   ;;  %v578_v21 = vld [vmem:[%s786_s1 + $0x30] ss:$8 sps:$4 sm:$0xff]   ;;  %vm165_vm7 = vcmask 523265  }
  0x12   : > { %391 = vmatprep.subr.bf16.mxu0 %v570_v8  ;;  %v688_v18 = vsel %vm159_vm5, %v160_v11, %v161_v13  ;;  %v579_v22 = vld [vmem:[%s786_s1 + $0x24] ss:$8 sps:$4 sm:$0xff]   ;;  %v581_v23 = vld [vmem:[%s786_s1 + $0x20] ss:$8 sps:$4 sm:$0xff]   ;;  %v582_v24 = vld [vmem:[%s786_s1 + $0x14] ss:$8 sps:$4 sm:$0xff]  }
  0x13   : > { %177 = vst.msk [vmem:[#allocation2 + $0x18] sm:$0x7f] %vm176_vm2, %v171_v14  ;;  %v172_v17 = vsel %vm169_vm4, %v170_v12, %v171_v14  ;;  %v584_v25 = vld [vmem:[%s786_s1 + $0x10] ss:$8 sps:$4 sm:$0xff]   ;;  %v585_v26 = vld [vmem:[%s786_s1 + $0x4] ss:$8 sps:$4 sm:$0xff]  }
  0x14   : > { %175 = vst.msk [vmem:[#allocation2 + $0x8] sm:$0xff] %vm167_vm3, %v172_v17  ;;  %150 = vrot.lane.b32.xlu0 %v145_v10, %s627_s25  ;;  %v587_v27 = vld [vmem:[%s786_s1] ss:$8 sps:$4 sm:$0xff]   ;;  %v588_v28 = vld [vmem:[%s786_s1 + $0xf4] ss:$8 sps:$4 sm:$0xff]   ;;  %s553_s4 = sshll.u32 %s789_s10, 5 }
  0x15   : > { %392 = vmatpush1.bf16.msra.mxu0 %v572_v15  ;;  %v590_v29 = vld [vmem:[%s786_s1 + $0xf0] ss:$8 sps:$4 sm:$0xff]   ;;  %v591_v30 = vld [vmem:[%s786_s1 + $0xe4] ss:$8 sps:$4 sm:$0xff]   ;;  %v593_v31 = vld [vmem:[%s786_s1 + $0xe0] ss:$8 sps:$4 sm:$0xff]   ;;  %s143_s7 = scalar_lea.vmem %s787_s2, %s553_s4 }
  0x16   : > { %393 = vmatprep.subr.bf16.mxu0 %v573_v16  ;;  %v594_v32 = vld [vmem:[%s786_s1 + $0xd4] ss:$8 sps:$4 sm:$0xff]   ;;  %v596_v33 = vld [vmem:[%s786_s1 + $0xd0] ss:$8 sps:$4 sm:$0xff]   ;;  %v597_v34 = vld [vmem:[%s786_s1 + $0xc4] ss:$8 sps:$4 sm:$0xff]  }
  0x17   : > { %v599_v35 = vld [vmem:[%s786_s1 + $0xc0] ss:$8 sps:$4 sm:$0xff]   ;;  %v217_v36 = vld [vmem:[%s786_s1 + $0xb0] sm:$0xff]  ;;  %v218_v37 = vld [vmem:[%s786_s1 + $0xb8] sm:$0xff] }
  0x18   : > { %v600_v38 = vld [vmem:[%s786_s1 + $0xb4] ss:$8 sps:$4 sm:$0xff]   ;;  %v540_v39 = vcombine.low %v217_v36, %v218_v37  ;;  %v216_v41 = vld [vmem:[%s786_s1 + $0xa8] sm:$0xff]  ;;  %v606_v45 = vld [vmem:[%s786_s1 + $0x90] ss:$8 sps:$4 sm:$0xff]  }
  0x19   : > { %394 = vmatpush1.bf16.msra.mxu0 %v575_v19  ;;  %v602_v42 = vld [vmem:[%s786_s1 + $0xa4] ss:$8 sps:$4 sm:$0xff]   ;;  %v538_v43 = vcombine.low %v215_v40, %v216_v41  ;;  %v604_v44 = vld [vmem:[%s786_s1 + $0x94] ss:$8 sps:$4 sm:$0xff]   ;;  %v609_v47 = vld [vmem:[%s786_s1 + $0x80] ss:$8 sps:$4 sm:$0xff]  }
  0x1a   : > { %395 = vmatprep.subr.bf16.mxu0 %v576_v20  ;;  %v607_v46 = vld [vmem:[%s786_s1 + $0x84] ss:$8 sps:$4 sm:$0xff]  }
  0x1d   : > { %396 = vmatpush1.bf16.msra.mxu0 %v578_v21 }
  0x1e   : > { %397 = vmatprep.subr.bf16.mxu0 %v579_v22 }
  0x21   : > { %398 = vmatpush1.bf16.msra.mxu0 %v581_v23 }
  0x22   : > { %399 = vmatprep.subr.bf16.mxu0 %v582_v24 }
  0x25   : > { %400 = vmatpush1.bf16.msra.mxu0 %v584_v25 }
  0x26   : > { %401 = vmatprep.subr.bf16.mxu0 %v585_v26 }
  0x29   : > { %402 = vmatpush1.bf16.msra.mxu0 %v587_v27 }
  0x2a   : > { %403 = vmatprep.subr.bf16.mxu0 %v588_v28 }
  0x2d   : > { %404 = vmatpush2.bf16.msra.mxu0 %v590_v29 }
  0x2e   : > { %405 = vmatprep.subr.bf16.mxu0 %v591_v30 }
  0x31   : > { %406 = vmatpush2.bf16.msra.mxu0 %v593_v31 }
  0x32   : > { %407 = vmatprep.subr.bf16.mxu0 %v594_v32 }
  0x35   : > { %408 = vmatpush2.bf16.msra.mxu0 %v596_v33 }
  0x36   : > { %409 = vmatprep.subr.bf16.mxu0 %v597_v34 }
  0x39   : > { %410 = vmatpush2.bf16.msra.mxu0 %v599_v35 }
  0x3a   : > { %411 = vmatprep.subr.bf16.mxu0 %v600_v38 }
  0x3d   : > { %412 = vmatpush2.bf16.msra.mxu0 %v540_v39 }
  0x3e   : > { %413 = vmatprep.subr.bf16.mxu0 %v602_v42 }
  0x41   : > { %414 = vmatpush2.bf16.msra.mxu0 %v538_v43 }
  0x42   : > { %415 = vmatprep.subr.bf16.mxu0 %v604_v44 }
  0x45   : > { %416 = vmatpush2.bf16.msra.mxu0 %v606_v45 }
  0x46   : > { %417 = vmatprep.subr.bf16.mxu0 %v607_v46 }
  0x49   : > { %418 = vmatpush2.bf16.msra.mxu0 %v609_v47 }
  0x82   : > { %v149_v49 = vpop.permute.xlu0 %148 }
  0x83   : > { %v185_v48 = vpop.permute.xlu1 %184  ;;  %155 = vst.msk [vmem:[#allocation2] sm:$0xff] %vm154_vm6, %v149_v49 }
  0x84   : > { %187 = vst.msk [vmem:[#allocation2 + $0x8] sm:$0xff] %vm154_vm6, %v185_v48  ;;  %188 = vst.msk [vmem:[#allocation2 + $0x18] sm:$0xff] %vm154_vm6, %v185_v48 }
  0x85   : > { %158 = vst.msk [vmem:[#allocation2] sm:$0x1] %vm157_vm0, %v626_v1 }
  0x86   : > { %166 = vst.msk [vmem:[#allocation2] sm:$0xfe] %vm165_vm7, %v160_v11  ;;  %v151_v50 = vpop.permute.xlu0 %150 }
  0x87   : > { %156 = vst.msk [vmem:[#allocation2 + $0x10] sm:$0xff] %vm154_vm6, %v151_v50 }
  0x88   : > { %168 = vst.msk [vmem:[#allocation2 + $0x10] sm:$0xff] %vm167_vm3, %v688_v18 }
  0x8b   : > { %v190_v51 = vld [vmem:[#allocation2 + $0x8] sm:$0xff]  ;;  %v192_v52 = vld [vmem:[#allocation2 + $0x18] sm:$0xff] }
  0x8c   : > { %v194_v53 = vpack.c.bf16 %v192_v52, %v190_v51 }
  0x8d   : > { %v189_v54 = vld [vmem:[#allocation2] sm:$0xff] }
  0x8e   : > { %419 = vmatprep.mubr.bf16.mxu0 %v194_v53 }
  0x8f   : > { %v191_v55 = vld [vmem:[#allocation2 + $0x10] sm:$0xff] }
  0x90   : > { %v193_v56 = vpack.c.bf16 %v191_v55, %v189_v54 }
  0x92   : > { %420 = vmatmul.mubr.bf16.vlgmr.msra.gmra.mxu0 %v193_v56 }
 0x152   : > { %v421_v57 = vpop.f32.mrf.mxu0 }
 0x153   : > { %v430_v58 = vmul.f32 0.5, %v421_v57 }
 0x154   : > { %v423_v59 = vpop.f32.mrf.mxu0 }
 0x155   : > { %610 = vtanh.f32 %v430_v58  ;;  %v431_v60 = vmul.f32 0.5, %v423_v59 }
 0x156   : > { %v425_v61 = vpop.f32.mrf.mxu0 }
 0x157   : > { %612 = vtanh.f32 %v431_v60  ;;  %v432_v62 = vmul.f32 0.5, %v425_v61 }
 0x158   : > { %v427_v63 = vpop.f32.mrf.mxu0 }
 0x159   : > { %614 = vtanh.f32 %v432_v62  ;;  %v433_v0 = vmul.f32 0.5, %v427_v63 }
 0x15b   : > { %616 = vtanh.f32 %v433_v0 }
 0x162   : > { %v611_v1 = vpop.eup %610 }
 0x163   : > { %v438_v2 = vmul.f32 0.5, %v611_v1 }
 0x164   : > { %v613_v3 = vpop.eup %612 }
 0x165   : > { %v442_v4 = vadd.f32 0.5, %v438_v2  ;;  %v439_v5 = vmul.f32 0.5, %v613_v3 }
 0x166   : > { %v615_v6 = vpop.eup %614 }
 0x167   : > { %v446_v7 = vmul.f32 %v442_v4, %v421_v57  ;;  %v443_v8 = vadd.f32 0.5, %v439_v5  ;;  %v440_v9 = vmul.f32 0.5, %v615_v6 }
 0x168   : > { %v617_v10 = vpop.eup %616 }
 0x169   : > { %450 = vst [vmem:[%s143_s7] sm:$0xff] %v446_v7  ;;  %v447_v11 = vmul.f32 %v443_v8, %v423_v59  ;;  %v444_v12 = vadd.f32 0.5, %v440_v9  ;;  %v441_v13 = vmul.f32 0.5, %v617_v10 }
 0x16b   : > { %451 = vst [vmem:[%s143_s7 + $0x8] sm:$0xff] %v447_v11  ;;  %v448_v14 = vmul.f32 %v444_v12, %v425_v61  ;;  %v445_v15 = vadd.f32 0.5, %v441_v13 }
 0x16d   : > { %452 = vst [vmem:[%s143_s7 + $0x10] sm:$0xff] %v448_v14  ;;  %v449_v16 = vmul.f32 %v445_v15, %v427_v63 }
 0x16f   : > { %453 = vst [vmem:[%s143_s7 + $0x18] sm:$0xff] %v449_v16 }
 0x170 PF: > { %s12_s9 = sadd.s32 1, %s624_s9  }
 0x171   : > { %p9_p4 = scmp.ge.s32.totalorder %s12_s9, 4  }
 0x173   :  { %11 = sbr.rel (!%p9_p4) target bundleno = 1 (0x1), region = 58 }

</bundles_post_ra>
